<compile_context>
chip_gen: v5e
topology: v5e:2x2
jax: 0.10.0
libtpu: 0.0.40
codegen_flags: <defaults>
</compile_context>

<pallas_src>
import functools

import jax
import jax.numpy as jnp
import numpy as np
from jax import lax
from jax.experimental import pallas as pl
from jax.experimental.pallas import tpu as pltpu


def _alignment_kernel(xcat_ref, w_ref, b_ref, bounds_ref, scal_ref, acw_ref,
                      out_ref, *, f_dim, r_dim, c_pad):
    B, T_x, _ = xcat_ref.shape
    T_y = scal_ref.shape[1]
    A = w_ref.shape[1]
    F, R = f_dim, r_dim
    C = A + F + R + 1

    # Hoisted whole-array loads (everything is tiny and VMEM-resident).
    xcat = xcat_ref[...]                         # (B, T_x, D_in) f32
    w = w_ref[...]                               # (D_in, A)
    bias = b_ref[...]                            # (1, A)
    bounds = bounds_ref[...]                     # (2, B, T_x) int32: [start; end)
    scal = scal_ref[...]                         # (B, T_y, 3) f32: [f0, rmse, pos]
    acw = acw_ref[...]                           # (4, Fmax) f32
    wf0, bf0 = acw[0, :F], acw[1, :F]
    wrm, brm = acw[2, :R], acw[3, :R]

    # Output-frame index along rows; shared across the batch (int32 compares).
    t = lax.broadcasted_iota(jnp.int32, (T_y, T_x), 0)

    zpad = None
    if c_pad > C:
        zpad = jnp.zeros((T_y, c_pad - C), jnp.float32)

    # B is tiny & static -> unrolled; every matmul stays rank-2 (clean MXU path).
    for bb in range(B):
        # linear([x, speaker_emb]) : (T_x, D_in) @ (D_in, A) + (1, A)
        x_lin = jnp.dot(xcat[bb], w, preferred_element_type=jnp.float32) + bias

        # repeat_interleave via one-hot(frame -> token) matmul.
        # onehot[t, k] = 1 iff start[k] <= t < end[k]; rows with t >= sum(dur)
        # are all-zero, matching the reference's new_zeros padding.
        start = bounds[0, bb][None, :]           # (1, T_x)
        end = bounds[1, bb][None, :]             # (1, T_x)
        onehot = jnp.logical_and(start <= t, t < end).astype(jnp.float32)
        x_exp = jnp.dot(onehot, x_lin, preferred_element_type=jnp.float32)  # (T_y, A)

        # acoustic embeddings: Linear(1, E) == scalar * w + b
        f0_emb = scal[bb, :, 0:1] * wf0 + bf0    # (T_y, F)
        rmse_emb = scal[bb, :, 1:2] * wrm + brm  # (T_y, R)
        pos = scal[bb, :, 2:3]                   # (T_y, 1)

        pieces = [x_exp, f0_emb, rmse_emb, pos]
        if zpad is not None:
            pieces.append(zpad)
        # One lane-dense (T_y, c_pad) store per batch row.
        out_ref[bb] = jnp.concatenate(pieces, axis=-1)


def alignment_forward(x, speaker, duration, f0, rmse, position, max_y_len, params):
    emb_table = params["speaker_emb"]                    # (num_speaker, S)
    W = params["linear_w"].astype(jnp.float32)           # (2E + S, A)
    b = params["linear_b"].astype(jnp.float32)           # (A,)
    wf0, bf0 = params["f0_w"], params["f0_b"]            # (F,), (F,)
    wrm, brm = params["rmse_w"], params["rmse_b"]        # (R,), (R,)

    B, T_x, _ = x.shape
    _, A = W.shape
    F = wf0.shape[0]
    R = wrm.shape[0]
    C = A + F + R + 1
    c_pad = ((C + 127) // 128) * 128                     # lane-dense padded output

    # Glue: speaker embedding lookup + feature concat (layout plumbing).
    spk_emb = jnp.take(emb_table, speaker, axis=0)                       # (B, T_x, S)
    x_cat = jnp.concatenate([x, spk_emb], axis=-1).astype(jnp.float32)   # (B, T_x, D_in)

    # Glue: per-token [start, end) frame bounds from durations (tiny cumsum).
    dur = duration.astype(jnp.int32)
    end = jnp.cumsum(dur, axis=1)
    start = end - dur
    bounds = jnp.stack([start, end], axis=0)             # (2, B, T_x) int32

    # Pack per-frame scalar streams into one array: [f0, rmse, position].
    scal = jnp.stack([f0, rmse, position], axis=-1).astype(jnp.float32)  # (B, T_y, 3)

    # Pack the two Linear(1, E) layers into one (4, Fmax) array.
    fmax = max(F, R)
    acw = jnp.zeros((4, fmax), jnp.float32)
    acw = acw.at[0, :F].set(wf0).at[1, :F].set(bf0)
    acw = acw.at[2, :R].set(wrm).at[3, :R].set(brm)

    kernel = functools.partial(_alignment_kernel, f_dim=F, r_dim=R, c_pad=c_pad)
    vmem = pl.BlockSpec(memory_space=pltpu.MemorySpace.VMEM)

    out = pl.pallas_call(
        kernel,
        out_shape=jax.ShapeDtypeStruct((B, max_y_len, c_pad), jnp.float32),
        in_specs=[vmem] * 6,
        out_specs=vmem,
    )(x_cat, W, b.reshape(1, A), bounds, scal, acw)

    # Slice the lane padding off (layout plumbing in the wrapper).
    return out[:, :, :C]


def alignment_reference(x, speaker, duration, f0, rmse, position, max_y_len, params):
    """Pure-JAX reference mirroring the PyTorch forward."""
    spk = params["speaker_emb"][speaker]
    xc = jnp.concatenate([x, spk], axis=-1)
    x_lin = xc @ params["linear_w"] + params["linear_b"]
    B, T_x, A = x_lin.shape
    cum = jnp.cumsum(duration.astype(jnp.int32), axis=1)
    t = jnp.arange(max_y_len, dtype=jnp.int32)
    idx = jnp.sum((cum[:, None, :] <= t[None, :, None]).astype(jnp.int32), axis=-1)
    valid = idx < T_x
    safe = jnp.minimum(idx, T_x - 1)
    x_exp = jnp.take_along_axis(x_lin, safe[..., None], axis=1)
    x_exp = jnp.where(valid[..., None], x_exp, 0.0)
    f0e = f0[..., None] * params["f0_w"] + params["f0_b"]
    rme = rmse[..., None] * params["rmse_w"] + params["rmse_b"]
    return jnp.concatenate([x_exp, f0e, rme, position[..., None]], axis=-1)


if __name__ == "__main__":
    # config
    num_speaker = 4
    speaker_embed_size = 8
    dur_encoder_size = 16          # x feature dim = 2 * dur_encoder_size = 32
    dur_alignment_size = 32
    f0_embed_size = 8
    rmse_embed_size = 8

    B, T_x, max_y_len = 2, 8, 24
    D_x = 2 * dur_encoder_size
    D_in = D_x + speaker_embed_size

    key = jax.random.PRNGKey(0)
    keys = jax.random.split(key, 12)

    params = {
        "speaker_emb": jax.random.normal(keys[0], (num_speaker, speaker_embed_size), jnp.float32) * 0.1,
        "linear_w": jax.random.normal(keys[1], (D_in, dur_alignment_size), jnp.float32) * 0.1,
        "linear_b": jax.random.normal(keys[2], (dur_alignment_size,), jnp.float32) * 0.1,
        "f0_w": jax.random.normal(keys[3], (f0_embed_size,), jnp.float32) * 0.1,
        "f0_b": jax.random.normal(keys[4], (f0_embed_size,), jnp.float32) * 0.1,
        "rmse_w": jax.random.normal(keys[5], (rmse_embed_size,), jnp.float32) * 0.1,
        "rmse_b": jax.random.normal(keys[6], (rmse_embed_size,), jnp.float32) * 0.1,
    }

    x = jax.random.normal(keys[7], (B, T_x, D_x), jnp.float32)
    speaker = jax.random.randint(keys[8], (B, T_x), 0, num_speaker, jnp.int32)
    duration = jax.random.randint(keys[9], (B, T_x), 1, 4, jnp.int32)  # sum <= 24
    f0 = jax.random.normal(keys[10], (B, max_y_len), jnp.float32)
    rmse = jax.random.normal(keys[11], (B, max_y_len), jnp.float32)
    position = jnp.tile(jnp.arange(max_y_len, dtype=jnp.float32)[None, :], (B, 1)) / max_y_len

    out = alignment_forward(x, speaker, duration, f0, rmse, position, max_y_len, params)
    out = jax.block_until_ready(out)

    ref = alignment_reference(x, speaker, duration, f0, rmse, position, max_y_len, params)
    ref = jax.block_until_ready(ref)

    assert out.shape == (B, max_y_len, dur_alignment_size + f0_embed_size + rmse_embed_size + 1)
    np.testing.assert_allclose(np.asarray(out), np.asarray(ref), rtol=1e-5, atol=1e-5)
    print("KERNEL_OK")
</pallas_src>

<mosaic_0001>
module attributes {stable_mosaic.version = 11 : i64} {
  func.func @_alignment_kernel(%arg0: memref<2x8x40xf32, #tpu.memory_space<vmem>>, %arg1: memref<40x32xf32, #tpu.memory_space<vmem>>, %arg2: memref<1x32xf32, #tpu.memory_space<vmem>>, %arg3: memref<2x2x8xi32, #tpu.memory_space<vmem>>, %arg4: memref<2x24x3xf32, #tpu.memory_space<vmem>>, %arg5: memref<4x8xf32, #tpu.memory_space<vmem>>, %arg6: memref<2x24x128xf32, #tpu.memory_space<vmem>>) attributes {dimension_semantics = [], scalar_prefetch = 0 : i64, scratch_operands = 0 : i64, tpu.core_type = #tpu.core_type<tc>} {
    %c0 = arith.constant 0 : index
    %c0_0 = arith.constant 0 : index
    %c0_1 = arith.constant 0 : index
    %0 = vector.load %arg0[%c0, %c0_0, %c0_1] : memref<2x8x40xf32, #tpu.memory_space<vmem>>, vector<2x8x40xf32>
    %c0_2 = arith.constant 0 : index
    %c0_3 = arith.constant 0 : index
    %1 = vector.load %arg1[%c0_2, %c0_3] : memref<40x32xf32, #tpu.memory_space<vmem>>, vector<40x32xf32>
    %c0_4 = arith.constant 0 : index
    %c0_5 = arith.constant 0 : index
    %2 = vector.load %arg2[%c0_4, %c0_5] : memref<1x32xf32, #tpu.memory_space<vmem>>, vector<1x32xf32>
    %c0_6 = arith.constant 0 : index
    %c0_7 = arith.constant 0 : index
    %c0_8 = arith.constant 0 : index
    %3 = vector.load %arg3[%c0_6, %c0_7, %c0_8] : memref<2x2x8xi32, #tpu.memory_space<vmem>>, vector<2x2x8xi32>
    %c0_9 = arith.constant 0 : index
    %c0_10 = arith.constant 0 : index
    %c0_11 = arith.constant 0 : index
    %4 = vector.load %arg4[%c0_9, %c0_10, %c0_11] : memref<2x24x3xf32, #tpu.memory_space<vmem>>, vector<2x24x3xf32>
    %c0_12 = arith.constant 0 : index
    %c0_13 = arith.constant 0 : index
    %5 = vector.load %arg5[%c0_12, %c0_13] : memref<4x8xf32, #tpu.memory_space<vmem>>, vector<4x8xf32>
    %6 = vector.extract_strided_slice %5 {offsets = [0, 0], sizes = [1, 8], strides = [1, 1]} : vector<4x8xf32> to vector<1x8xf32>
    %7 = vector.shape_cast %6 : vector<1x8xf32> to vector<8xf32>
    %8 = vector.extract_strided_slice %5 {offsets = [1, 0], sizes = [1, 8], strides = [1, 1]} : vector<4x8xf32> to vector<1x8xf32>
    %9 = vector.shape_cast %8 : vector<1x8xf32> to vector<8xf32>
    %10 = vector.extract_strided_slice %5 {offsets = [2, 0], sizes = [1, 8], strides = [1, 1]} : vector<4x8xf32> to vector<1x8xf32>
    %11 = vector.shape_cast %10 : vector<1x8xf32> to vector<8xf32>
    %12 = vector.extract_strided_slice %5 {offsets = [3, 0], sizes = [1, 8], strides = [1, 1]} : vector<4x8xf32> to vector<1x8xf32>
    %13 = vector.shape_cast %12 : vector<1x8xf32> to vector<8xf32>
    %14 = tpu.iota {dimensions = array<i32: 0>} : vector<24x8xi32>
    %cst = arith.constant 0.000000e+00 : f32
    %15 = vector.broadcast %cst : f32 to vector<24x79xf32>
    %16 = vector.extract_strided_slice %0 {offsets = [0, 0, 0], sizes = [1, 8, 40], strides = [1, 1, 1]} : vector<2x8x40xf32> to vector<1x8x40xf32>
    %17 = vector.shape_cast %16 : vector<1x8x40xf32> to vector<8x40xf32>
    %cst_14 = arith.constant dense<0.000000e+00> : vector<8x32xf32>
    %18 = tpu.matmul %17, %1, %cst_14 {dimension_numbers = #tpu.dot_dimension_numbers<[1], [0], [0], [1], [0, 0, 1, 1], [], []>} : vector<8x40xf32>, vector<40x32xf32>, vector<8x32xf32> -> vector<8x32xf32>
    %19 = vector.broadcast %2 : vector<1x32xf32> to vector<8x32xf32>
    %20 = arith.addf %18, %19 : vector<8x32xf32>
    %21 = vector.extract_strided_slice %3 {offsets = [0, 0, 0], sizes = [1, 1, 8], strides = [1, 1, 1]} : vector<2x2x8xi32> to vector<1x1x8xi32>
    %22 = vector.shape_cast %21 : vector<1x1x8xi32> to vector<8xi32>
    %23 = vector.shape_cast %22 : vector<8xi32> to vector<1x8xi32>
    %24 = vector.extract_strided_slice %3 {offsets = [1, 0, 0], sizes = [1, 1, 8], strides = [1, 1, 1]} : vector<2x2x8xi32> to vector<1x1x8xi32>
    %25 = vector.shape_cast %24 : vector<1x1x8xi32> to vector<8xi32>
    %26 = vector.shape_cast %25 : vector<8xi32> to vector<1x8xi32>
    %27 = vector.broadcast %23 : vector<1x8xi32> to vector<24x8xi32>
    %28 = arith.cmpi sle, %27, %14 : vector<24x8xi32>
    %29 = vector.broadcast %26 : vector<1x8xi32> to vector<24x8xi32>
    %30 = arith.cmpi slt, %14, %29 : vector<24x8xi32>
    %31 = arith.andi %28, %30 : vector<24x8xi1>
    %32 = arith.extui %31 : vector<24x8xi1> to vector<24x8xi32>
    %33 = arith.sitofp %32 : vector<24x8xi32> to vector<24x8xf32>
    %cst_15 = arith.constant dense<0.000000e+00> : vector<24x32xf32>
    %34 = tpu.matmul %33, %20, %cst_15 {dimension_numbers = #tpu.dot_dimension_numbers<[1], [0], [0], [1], [0, 0, 1, 1], [], []>} : vector<24x8xf32>, vector<8x32xf32>, vector<24x32xf32> -> vector<24x32xf32>
    %35 = vector.extract_strided_slice %4 {offsets = [0, 0, 0], sizes = [1, 24, 1], strides = [1, 1, 1]} : vector<2x24x3xf32> to vector<1x24x1xf32>
    %36 = vector.shape_cast %35 : vector<1x24x1xf32> to vector<24x1xf32>
    %37 = vector.shape_cast %7 : vector<8xf32> to vector<1x8xf32>
    %38 = vector.broadcast %36 : vector<24x1xf32> to vector<24x8xf32>
    %39 = vector.broadcast %37 : vector<1x8xf32> to vector<24x8xf32>
    %40 = arith.mulf %38, %39 : vector<24x8xf32>
    %41 = vector.shape_cast %9 : vector<8xf32> to vector<1x8xf32>
    %42 = vector.broadcast %41 : vector<1x8xf32> to vector<24x8xf32>
    %43 = arith.addf %40, %42 : vector<24x8xf32>
    %44 = vector.extract_strided_slice %4 {offsets = [0, 0, 1], sizes = [1, 24, 1], strides = [1, 1, 1]} : vector<2x24x3xf32> to vector<1x24x1xf32>
    %45 = vector.shape_cast %44 : vector<1x24x1xf32> to vector<24x1xf32>
    %46 = vector.shape_cast %11 : vector<8xf32> to vector<1x8xf32>
    %47 = vector.broadcast %45 : vector<24x1xf32> to vector<24x8xf32>
    %48 = vector.broadcast %46 : vector<1x8xf32> to vector<24x8xf32>
    %49 = arith.mulf %47, %48 : vector<24x8xf32>
    %50 = vector.shape_cast %13 : vector<8xf32> to vector<1x8xf32>
    %51 = vector.broadcast %50 : vector<1x8xf32> to vector<24x8xf32>
    %52 = arith.addf %49, %51 : vector<24x8xf32>
    %53 = vector.extract_strided_slice %4 {offsets = [0, 0, 2], sizes = [1, 24, 1], strides = [1, 1, 1]} : vector<2x24x3xf32> to vector<1x24x1xf32>
    %54 = vector.shape_cast %53 : vector<1x24x1xf32> to vector<24x1xf32>
    %55 = tpu.concatenate %34, %43, %52, %54, %15 in 1 : vector<24x32xf32>, vector<24x8xf32>, vector<24x8xf32>, vector<24x1xf32>, vector<24x79xf32> -> vector<24x128xf32>
    %c0_16 = arith.constant 0 : index
    %c0_17 = arith.constant 0 : index
    %c0_18 = arith.constant 0 : index
    %56 = vector.load %arg6[%c0_16, %c0_17, %c0_18] : memref<2x24x128xf32, #tpu.memory_space<vmem>>, vector<1x24x128xf32>
    %57 = vector.shape_cast %56 : vector<1x24x128xf32> to vector<24x128xf32>
    %58 = vector.shape_cast %55 : vector<24x128xf32> to vector<1x24x128xf32>
    tpu.vector_store %arg6[%c0_16, %c0_17, %c0_18], %58 {strides = array<i32>} : memref<2x24x128xf32, #tpu.memory_space<vmem>>, vector<1x24x128xf32>,
    %59 = vector.extract_strided_slice %0 {offsets = [1, 0, 0], sizes = [1, 8, 40], strides = [1, 1, 1]} : vector<2x8x40xf32> to vector<1x8x40xf32>
    %60 = vector.shape_cast %59 : vector<1x8x40xf32> to vector<8x40xf32>
    %cst_19 = arith.constant dense<0.000000e+00> : vector<8x32xf32>
    %61 = tpu.matmul %60, %1, %cst_19 {dimension_numbers = #tpu.dot_dimension_numbers<[1], [0], [0], [1], [0, 0, 1, 1], [], []>} : vector<8x40xf32>, vector<40x32xf32>, vector<8x32xf32> -> vector<8x32xf32>
    %62 = vector.broadcast %2 : vector<1x32xf32> to vector<8x32xf32>
    %63 = arith.addf %61, %62 : vector<8x32xf32>
    %64 = vector.extract_strided_slice %3 {offsets = [0, 1, 0], sizes = [1, 1, 8], strides = [1, 1, 1]} : vector<2x2x8xi32> to vector<1x1x8xi32>
    %65 = vector.shape_cast %64 : vector<1x1x8xi32> to vector<8xi32>
    %66 = vector.shape_cast %65 : vector<8xi32> to vector<1x8xi32>
    %67 = vector.extract_strided_slice %3 {offsets = [1, 1, 0], sizes = [1, 1, 8], strides = [1, 1, 1]} : vector<2x2x8xi32> to vector<1x1x8xi32>
    %68 = vector.shape_cast %67 : vector<1x1x8xi32> to vector<8xi32>
    %69 = vector.shape_cast %68 : vector<8xi32> to vector<1x8xi32>
    %70 = vector.broadcast %66 : vector<1x8xi32> to vector<24x8xi32>
    %71 = arith.cmpi sle, %70, %14 : vector<24x8xi32>
    %72 = vector.broadcast %69 : vector<1x8xi32> to vector<24x8xi32>
    %73 = arith.cmpi slt, %14, %72 : vector<24x8xi32>
    %74 = arith.andi %71, %73 : vector<24x8xi1>
    %75 = arith.extui %74 : vector<24x8xi1> to vector<24x8xi32>
    %76 = arith.sitofp %75 : vector<24x8xi32> to vector<24x8xf32>
    %cst_20 = arith.constant dense<0.000000e+00> : vector<24x32xf32>
    %77 = tpu.matmul %76, %63, %cst_20 {dimension_numbers = #tpu.dot_dimension_numbers<[1], [0], [0], [1], [0, 0, 1, 1], [], []>} : vector<24x8xf32>, vector<8x32xf32>, vector<24x32xf32> -> vector<24x32xf32>
    %78 = vector.extract_strided_slice %4 {offsets = [1, 0, 0], sizes = [1, 24, 1], strides = [1, 1, 1]} : vector<2x24x3xf32> to vector<1x24x1xf32>
    %79 = vector.shape_cast %78 : vector<1x24x1xf32> to vector<24x1xf32>
    %80 = vector.shape_cast %7 : vector<8xf32> to vector<1x8xf32>
    %81 = vector.broadcast %79 : vector<24x1xf32> to vector<24x8xf32>
    %82 = vector.broadcast %80 : vector<1x8xf32> to vector<24x8xf32>
    %83 = arith.mulf %81, %82 : vector<24x8xf32>
    %84 = vector.shape_cast %9 : vector<8xf32> to vector<1x8xf32>
    %85 = vector.broadcast %84 : vector<1x8xf32> to vector<24x8xf32>
    %86 = arith.addf %83, %85 : vector<24x8xf32>
    %87 = vector.extract_strided_slice %4 {offsets = [1, 0, 1], sizes = [1, 24, 1], strides = [1, 1, 1]} : vector<2x24x3xf32> to vector<1x24x1xf32>
    %88 = vector.shape_cast %87 : vector<1x24x1xf32> to vector<24x1xf32>
    %89 = vector.shape_cast %11 : vector<8xf32> to vector<1x8xf32>
    %90 = vector.broadcast %88 : vector<24x1xf32> to vector<24x8xf32>
    %91 = vector.broadcast %89 : vector<1x8xf32> to vector<24x8xf32>
    %92 = arith.mulf %90, %91 : vector<24x8xf32>
    %93 = vector.shape_cast %13 : vector<8xf32> to vector<1x8xf32>
    %94 = vector.broadcast %93 : vector<1x8xf32> to vector<24x8xf32>
    %95 = arith.addf %92, %94 : vector<24x8xf32>
    %96 = vector.extract_strided_slice %4 {offsets = [1, 0, 2], sizes = [1, 24, 1], strides = [1, 1, 1]} : vector<2x24x3xf32> to vector<1x24x1xf32>
    %97 = vector.shape_cast %96 : vector<1x24x1xf32> to vector<24x1xf32>
    %98 = tpu.concatenate %77, %86, %95, %97, %15 in 1 : vector<24x32xf32>, vector<24x8xf32>, vector<24x8xf32>, vector<24x1xf32>, vector<24x79xf32> -> vector<24x128xf32>
    %c1 = arith.constant 1 : index
    %c0_21 = arith.constant 0 : index
    %c0_22 = arith.constant 0 : index
    %99 = vector.load %arg6[%c1, %c0_21, %c0_22] : memref<2x24x128xf32, #tpu.memory_space<vmem>>, vector<1x24x128xf32>
    %100 = vector.shape_cast %99 : vector<1x24x128xf32> to vector<24x128xf32>
    %101 = vector.shape_cast %98 : vector<24x128xf32> to vector<1x24x128xf32>
    tpu.vector_store %arg6[%c1, %c0_21, %c0_22], %101 {strides = array<i32>} : memref<2x24x128xf32, #tpu.memory_space<vmem>>, vector<1x24x128xf32>,
    return
  }
}

</mosaic_0001>

<bundles_post_ra>
// kernel: tpu_custom_call.1
= control target key start
LH: loop header
LB: loop body
LE: loop exit
PB: predicated region body
PF: predicated region fallthrough
CT: control target
= control target key end

     0   :  { %v459_v3 = vmov 0   ;;  %v460_v7 = vmov 1   ;;  %s659_s0 = inlined_call_operand.vmem [shape: f32[2,8,40], index: 0, kind: input, shape index: {}]   ;;  %s660_s1 = inlined_call_operand.vmem [shape: f32[40,32], index: 1, kind: input, shape index: {}]   ;;  %s661_s2 = inlined_call_operand.vmem [shape: f32[1,32], index: 2, kind: input, shape index: {}]   ;;  %s662_s3 = inlined_call_operand.vmem [shape: s32[2,2,8], index: 3, kind: input, shape index: {}]   ;;  %s663_s4 = inlined_call_operand.vmem [shape: f32[2,24,3], index: 4, kind: input, shape index: {}]   ;;  %s664_s5 = inlined_call_operand.vmem [shape: f32[4,8], index: 5, kind: input, shape index: {}]   ;;  %s665_s6 = inlined_call_operand.hbm [shape: f32[2,24,128], index: 6, kind: output, shape index: {}]  }
   0x1   :  { %v30_v0 = vld [vmem:[%s660_s1 + $0x20] sm:$0xff]  ;;  %v36_v1 = vld [vmem:[%s663_s4 + $0x10] sm:$0xff]  ;;  %424 = vset.pattern.permute.xlu1 %v459_v3  ;;  %423 = vset.pattern.permute.xlu0 %v459_v3  ;;  %v29_v4 = vld [vmem:[%s660_s1 + $0x18] sm:$0xff] }
   0x2   :  { %v34_v2 = vld [vmem:[%s663_s4] sm:$0xff]  ;;  %63 = vmatpush.msra.mxu0 %v30_v0  ;;  %233 = vmatpush.msra.mxu2 %v30_v0  ;;  %v28_v5 = vld [vmem:[%s660_s1 + $0x10] sm:$0xff]  ;;  %v27_v6 = vld [vmem:[%s660_s1 + $0x8] sm:$0xff] }
   0x3   :  { %137 = vperm.xlu1 %424, %v36_v1   ;;  %127 = vperm.xlu0 %423, %v34_v2  }
   0x4   :  { %64 = vmatpush.msra.mxu0 %v29_v4  ;;  %234 = vmatpush.msra.mxu2 %v29_v4 }
   0x5   :  { %426 = vset.pattern.permute.xlu2 %v460_v7 }
   0x6   :  { %11 = vsyncpa [#allocation3], 0  ;;  %65 = vmatpush.msra.mxu0 %v28_v5  ;;  %235 = vmatpush.msra.mxu2 %v28_v5  ;;  %v35_v8 = vld [vmem:[%s663_s4 + $0x8] sm:$0xff]  ;;  %v26_v9 = vld [vmem:[%s660_s1] sm:$0xff]  ;;  %vm48_vm0 = vcmask 326656   ;;  %s461_s21 = smov 46   ;;  %v41_v28 = vlaneseq }
   0x7   :  { %153 = vperm.xlu2 %426, %v35_v8   ;;  %v24_v10 = vld [vmem:[%s659_s0] sm:$0xff]  ;;  %v25_v11 = vld [vmem:[%s659_s0 + $0x8] sm:$0xff]  ;;  %v543_v13 = vld [vmem:[%s663_s4 + $0x18] sm:$0xff]  ;;  %s462_s23 = smov 32   ;;  %v463_v53 = vmov 0.0   ;;  %s464_s28 = smov 40  }
   0x8   :  { %66 = vmatpush.msra.mxu0 %v27_v6  ;;  %236 = vmatpush.msra.mxu2 %v27_v6  ;;  %v538_v12 = vld [vmem:[%s663_s4 + $0x28] sm:$0xff]  ;;  %v549_v14 = vld [vmem:[%s663_s4 + $0x20] sm:$0xff]  ;;  %v42_v36 = vshrl.u32 %v41_v28, 7  ;;  %vm89_vm4 = vcmask 64512   ;;  %s388_s8 = sshll.u32 %s665_s6, 4  ;;  %s466_s9 = smov 128   ;;  %s389_s8 = int_to_ptr.hbm [resolvable:$true] %s388_s8 }
   0x9   :  { %v40_v17 = vld [vmem:[%s664_s5] sm:$0xf]  ;;  %s467_s10 = smov 8  }
   0xa   :  { %67 = vmatpush.msra.mxu0 %v26_v9  ;;  %237 = vmatpush.msra.mxu2 %v26_v9  ;;  %v140_v18 = vperm.slane %v40_v17, 0  ;;  %v564_v19 = vperm.slane %v40_v17, 1  ;;  %v32_v29 = vld [vmem:[%s662_s3] sm:$0x3]  ;;  %v33_v30 = vld [vmem:[%s662_s3 + $0x2] sm:$0x3] }
   0xb   :  { %425 = vset.pattern.permute.xlu1 %v460_v7  ;;  %132 = vperm.xlu0 %423, %v35_v8   ;;  %v576_v32 = vperm.slane %v40_v17, 2  ;;  %v579_v37 = vperm.slane %v32_v29, 0  ;;  %v581_v38 = vperm.slane %v33_v30, 0  ;;  %v584_v40 = vperm.slane %v40_v17, 3  ;;  %v432_v46 = vld [vmem:[%s661_s2] ss:$0 sm:$0xff] }
   0xc   :  { %400 = vmatmul.msk.f32.vlgmr.msra.gmra.mxu0 %vm48_vm0, %v24_v10  ;;  %407 = vmatmul.msk.f32.vlgmr.msra.gmra.mxu2 %vm48_vm0, %v25_v11  ;;  %v242_v47 = vperm.slane %v32_v29, 1  ;;  %v246_v48 = vperm.slane %v33_v30, 1  ;;  %v43_v50 = vadd.s32 8, %v42_v36  ;;  %s465_s2 = smov [#allocation2]  }
   0xd   :  { %149 = vperm.xlu1 %425, %v34_v2   ;;  %vm73_vm1 = vcmp.le.s32.totalorder %v579_v37, %v42_v36  ;;  %vm77_vm2 = vcmp.lt.s32.totalorder %v42_v36, %v581_v38  ;;  %s386_s29 = sshll.u32 %s465_s2, 4  ;;  %s387_s29 = int_to_ptr.vmem [resolvable:$true] %s386_s29 }
   0xe   :  { %vm80_vm3 = vmand %vm73_vm1, %vm77_vm2  ;;  %vm243_vm5 = vcmp.le.s32.totalorder %v242_v47, %v42_v36  ;;  %vm247_vm6 = vcmp.lt.s32.totalorder %v42_v36, %v246_v48  ;;  %vm74_vm7 = vcmp.le.s32.totalorder %v579_v37, %v43_v50  ;;  %vm78_vm8 = vcmp.lt.s32.totalorder %v43_v50, %v581_v38 }
   0xf   :  { %157 = vperm.xlu2 %426, %v36_v1   ;;  %v401_v54 = vsel %vm80_vm3, 1.0, %v463_v53  ;;  %vm250_vm9 = vmand %vm243_vm5, %vm247_vm6  ;;  %vm244_vm11 = vcmp.le.s32.totalorder %v242_v47, %v43_v50  ;;  %vm248_vm12 = vcmp.lt.s32.totalorder %v43_v50, %v246_v48  ;;  %vm201_vm6 = vcmask 261120  }
  0x10   :  { %vm81_vm10 = vmand %vm74_vm7, %vm78_vm8  ;;  %v408_v0 = vsel %vm250_vm9, 1.0, %v463_v53  ;;  %vm208_vm7 = vcmask 392192   ;;  %vm212_vm8 = vcmask 400384  }
  0x11   :  { %v402_v4 = vsel %vm81_vm10, 1.0, %v463_v53  ;;  %vm251_vm15 = vmand %vm244_vm11, %vm248_vm12 }
  0x12   :  { %v409_v10 = vsel %vm251_vm15, 1.0, %v463_v53 }
  0x13   :  { %306 = vperm.xlu0 %423, %v538_v12  }
  0x15   :  { %427 = vset.pattern.permute.xlu1 %v459_v3 }
  0x16   :  { %296 = vperm.xlu1 %427, %v543_v13  }
  0x17   :  { %428 = vset.pattern.permute.xlu2 %v459_v3 }
  0x18   :  { %301 = vperm.xlu2 %428, %v549_v14  }
  0x1b   :  { %431 = vset.pattern.permute.xlu0 %v460_v7 }
  0x1c   :  { %324 = vperm.xlu0 %431, %v538_v12  }
  0x1e   :  { %429 = vset.pattern.permute.xlu1 %v460_v7 }
  0x1f   :  { %316 = vperm.xlu1 %429, %v543_v13  }
  0x20   :  { %430 = vset.pattern.permute.xlu2 %v460_v7 }
  0x21   :  { %320 = vperm.xlu2 %430, %v549_v14  }
  0x24   :  { %196 = vrot.lane.b32.xlu0 %v36_v1, %s461_s21  ;;  %v44_v1 = vadd.s32 16, %v42_v36 }
  0x26   :  { %vm75_vm13 = vcmp.le.s32.totalorder %v579_v37, %v44_v1  ;;  %vm79_vm14 = vcmp.lt.s32.totalorder %v44_v1, %v581_v38  ;;  %vm245_vm2 = vcmp.le.s32.totalorder %v242_v47, %v44_v1  ;;  %vm249_vm3 = vcmp.lt.s32.totalorder %v44_v1, %v246_v48 }
  0x27   :  { %192 = vrot.lane.b32.xlu1 %v34_v2, %s461_s21  ;;  %vm82_vm1 = vmand %vm75_vm13, %vm79_vm14 }
  0x28   :  { %vm252_vm5 = vmand %vm245_vm2, %vm249_vm3 }
  0x29   :  { %194 = vrot.lane.b32.xlu2 %v35_v8, %s461_s21 }
  0x61   :  { %v559_v15 = vpop.permute.xlu2 %153 }
  0x62   :  { %v162_v59 = vmul.f32 %v576_v32, %v559_v15  ;;  %v403_v15 = vsel %vm82_vm1, 1.0, %v463_v53 }
  0x64   :  { %v166_v7 = vadd.f32 %v584_v40, %v162_v59 }
  0x69   :  { %v158_v16 = vpop.permute.xlu2 %157 }
  0x6a   :  { %v163_v41 = vmul.f32 %v576_v32, %v158_v16  ;;  %v410_v16 = vsel %vm252_vm5, 1.0, %v463_v53 }
  0x6c   :  { %v167_v43 = vadd.f32 %v584_v40, %v163_v41 }
  0x72   :  { %v302_v24 = vpop.permute.xlu2 %301 }
  0x73   :  { %v310_v27 = vmul.f32 %v302_v24, %v140_v18 }
  0x75   :  { %v128_v20 = vpop.permute.xlu0 %127  ;;  %v138_v21 = vpop.permute.xlu1 %137  ;;  %v313_v34 = vadd.f32 %v310_v27, %v564_v19 }
  0x76   :  { %v141_v22 = vmul.f32 %v140_v18, %v128_v20  ;;  %v143_v23 = vmul.f32 %v140_v18, %v138_v21 }
  0x78   :  { %v145_v25 = vadd.f32 %v564_v19, %v141_v22  ;;  %v147_v26 = vadd.f32 %v564_v19, %v143_v23 }
  0x7a   :  { %171 = vrot.lane.b32.xlu0 %v145_v25, %s462_s23  ;;  %175 = vrot.lane.b32.xlu2 %v147_v26, %s462_s23 }
  0x7b   :  { %v321_v6 = vpop.permute.xlu2 %320 }
  0x7c   :  { %v328_v8 = vmul.f32 %v321_v6, %v576_v32 }
  0x7d   :  { %v133_v31 = vpop.permute.xlu0 %132 }
  0x7e   :  { %v142_v33 = vmul.f32 %v140_v18, %v133_v31  ;;  %v331_v11 = vadd.f32 %v328_v8, %v584_v40 }
  0x7f   :  { %v150_v35 = vpop.permute.xlu1 %149 }
  0x80   :  { %v146_v39 = vadd.f32 %v564_v19, %v142_v33  ;;  %v161_v42 = vmul.f32 %v576_v32, %v150_v35 }
  0x82   :  { %173 = vrot.lane.b32.xlu1 %v146_v39, %s462_s23  ;;  %338 = vrot.lane.b32.xlu0 %v313_v34, %s462_s23  ;;  %v165_v44 = vadd.f32 %v584_v40, %v161_v42 }
  0x85   :  { %v307_v45 = vpop.permute.xlu0 %306 }
  0x86   :  { %v311_v57 = vmul.f32 %v307_v45, %v140_v18 }
  0x88   :  { %v297_v49 = vpop.permute.xlu1 %296  ;;  %v314_v62 = vadd.f32 %v311_v57, %v564_v19 }
  0x89   :  { %v309_v51 = vmul.f32 %v297_v49, %v140_v18  ;;  %v69_v52 = vpop.f32.mrf.mxu0  ;;  %v195_v18 = vpop.permute.xlu2 %194 }
  0x8a   :  { %183 = vrot.lane.b32.xlu1 %v165_v44, %s464_s28  ;;  %v70_v55 = vadd.f32 %v432_v46, %v69_v52  ;;  %187 = vrot.lane.b32.xlu0 %v167_v43, %s464_s28 }
  0x8b   :  { %v312_v56 = vadd.f32 %v309_v51, %v564_v19 }
  0x8c   :  { %114 = vmatpush.msra.mxu1 %v70_v55 }
  0x8d   :  { %336 = vrot.lane.b32.xlu2 %v312_v56, %s462_s23  ;;  %404 = vmatmul.msk.f32.vlgmr.msra.gmra.mxu1 %vm89_vm4, %v401_v54 }
  0x8e   :  { %v325_v58 = vpop.permute.xlu0 %324 }
  0x8f   :  { %v239_v60 = vpop.f32.mrf.mxu2  ;;  %v329_v61 = vmul.f32 %v325_v58, %v576_v32 }
  0x90   :  { %v240_v63 = vadd.f32 %v432_v46, %v239_v60 }
  0x91   :  { %v317_v2 = vpop.permute.xlu1 %316  ;;  %v332_v3 = vadd.f32 %v329_v61, %v584_v40 }
  0x92   :  { %283 = vmatpush.msra.mxu3 %v240_v63  ;;  %340 = vrot.lane.b32.xlu1 %v314_v62, %s462_s23  ;;  %v327_v5 = vmul.f32 %v317_v2, %v576_v32 }
  0x93   :  { %411 = vmatmul.msk.f32.vlgmr.msra.gmra.mxu3 %vm89_vm4, %v408_v0  ;;  %352 = vrot.lane.b32.xlu0 %v332_v3, %s464_s28 }
  0x94   :  { %v330_v9 = vadd.f32 %v327_v5, %v584_v40 }
  0x95   :  { %185 = vrot.lane.b32.xlu2 %v166_v7, %s464_s28  ;;  %405 = vmatmul.msk.f32.gmra.mxu1 %vm89_vm4, %v402_v4 }
  0x96   :  { %v197_v20 = vpop.permute.xlu0 %196 }
  0x99   :  { %v193_v17 = vpop.permute.xlu1 %192 }
  0x9a   :  { %348 = vrot.lane.b32.xlu1 %v330_v9, %s464_s28 }
  0x9b   :  { %412 = vmatmul.msk.f32.gmra.mxu3 %vm89_vm4, %v409_v10  ;;  %361 = vrot.lane.b32.xlu0 %v538_v12, %s461_s21 }
  0x9d   :  { %406 = vmatmul.msk.f32.gmra.mxu1 %vm89_vm4, %v403_v15  ;;  %350 = vrot.lane.b32.xlu2 %v331_v11, %s464_s28 }
  0xa2   :  { %357 = vrot.lane.b32.xlu1 %v543_v13, %s461_s21 }
  0xa3   :  { %413 = vmatmul.msk.f32.gmra.mxu3 %vm89_vm4, %v410_v16 }
  0xa5   :  { %359 = vrot.lane.b32.xlu2 %v549_v14, %s461_s21 }
  0xd4   :  { %v176_v21 = vpop.permute.xlu2 %175 }
  0xe7   :  { %v337_v23 = vpop.permute.xlu2 %336 }
  0xec   :  { %v172_v22 = vpop.permute.xlu0 %171 }
  0xef   :  { %v186_v27 = vpop.permute.xlu2 %185 }
  0xf4   :  { %v174_v19 = vpop.permute.xlu1 %173  ;;  %v339_v25 = vpop.permute.xlu0 %338 }
  0xf7   :  { %v351_v35 = vpop.permute.xlu2 %350 }
  0xfc   :  { %v184_v12 = vpop.permute.xlu1 %183  ;;  %v188_v33 = vpop.permute.xlu0 %187 }
  0xff   :  { %v360_v51 = vpop.permute.xlu2 %359 }
 0x104   :  { %v341_v24 = vpop.permute.xlu1 %340 }
 0x105   :  { %v353_v47 = vpop.permute.xlu0 %352 }
 0x10a   :  { %v116_v26 = vpop.f32.mrf.mxu1 }
 0x10b   :  { %v202_v13 = vsel %vm201_vm6, %v116_v26, %v172_v22 }
 0x10c   :  { %v205_v28 = vsel %vm48_vm0, %v202_v13, %v184_v12  ;;  %v349_v14 = vpop.permute.xlu1 %348 }
 0x10d   :  { %v209_v29 = vsel %vm208_vm7, %v205_v28, %v193_v17  ;;  %v362_v57 = vpop.permute.xlu0 %361 }
 0x10e   :  { %v213_v30 = vsel %vm212_vm8, %v209_v29, 0.0 }
 0x10f   :  { %216 = vst [vmem:[#allocation2] sm:$0xff] %v213_v30 }
 0x112   :  { %v119_v31 = vpop.f32.mrf.mxu1 }
 0x113   :  { %v203_v32 = vsel %vm201_vm6, %v119_v31, %v174_v19 }
 0x114   :  { %v206_v34 = vsel %vm48_vm0, %v203_v32, %v186_v27  ;;  %v358_v39 = vpop.permute.xlu1 %357 }
 0x115   :  { %v210_v36 = vsel %vm208_vm7, %v206_v34, %v195_v18 }
 0x116   :  { %v214_v37 = vsel %vm212_vm8, %v210_v36, 0.0  ;;  %v285_v38 = vpop.f32.mrf.mxu3 }
 0x117   :  { %217 = vst [vmem:[#allocation2 + $0x8] sm:$0xff] %v214_v37  ;;  %v366_v40 = vsel %vm201_vm6, %v285_v38, %v337_v23 }
 0x118   :  { %v369_v41 = vsel %vm48_vm0, %v366_v40, %v349_v14 }
 0x119   :  { %v372_v42 = vsel %vm208_vm7, %v369_v41, %v358_v39 }
 0x11a   :  { %v375_v43 = vsel %vm212_vm8, %v372_v42, 0.0  ;;  %v122_v44 = vpop.f32.mrf.mxu1 }
 0x11b   :  { %379 = vst [vmem:[#allocation2 + $0x18] sm:$0xff] %v375_v43  ;;  %v204_v45 = vsel %vm201_vm6, %v122_v44, %v176_v21 }
 0x11c   :  { %v207_v46 = vsel %vm48_vm0, %v204_v45, %v188_v33 }
 0x11d   :  { %v211_v48 = vsel %vm208_vm7, %v207_v46, %v197_v20 }
 0x11e   :  { %v215_v49 = vsel %vm212_vm8, %v211_v48, 0.0  ;;  %v288_v50 = vpop.f32.mrf.mxu3 }
 0x11f   :  { %218 = vst [vmem:[#allocation2 + $0x10] sm:$0xff] %v215_v49  ;;  %v367_v52 = vsel %vm201_vm6, %v288_v50, %v339_v25 }
 0x120   :  { %v370_v53 = vsel %vm48_vm0, %v367_v52, %v351_v35 }
 0x121   :  { %v373_v54 = vsel %vm208_vm7, %v370_v53, %v360_v51 }
 0x122   :  { %v376_v55 = vsel %vm212_vm8, %v373_v54, 0.0 }
 0x123   :  { %380 = vst [vmem:[#allocation2 + $0x20] sm:$0xff] %v376_v55 }
 0x126   :  { %v291_v56 = vpop.f32.mrf.mxu3 }
 0x127   :  { %v368_v58 = vsel %vm201_vm6, %v291_v56, %v341_v24 }
 0x128   :  { %v371_v59 = vsel %vm48_vm0, %v368_v58, %v353_v47 }
 0x129   :  { %v374_v60 = vsel %vm208_vm7, %v371_v59, %v362_v57 }
 0x12a   :  { %v377_v61 = vsel %vm212_vm8, %v374_v60, 0.0 }
 0x12b   :  { %381 = vst [vmem:[#allocation2 + $0x28] sm:$0xff] %v377_v61 }
 0x12c   :  { %394 = dma.vmem_to_hbm [thread:$0]  %s387_s29, 768, %s389_s8, [#allocation3], %s466_s9, %s466_s9, %s467_s10  }
 0x12d   :  { %457 = dma.done.wait [#allocation3], 768  }
 0x12e   :  { %458 = vsyncadd [#allocation3], 4294966528 }
 0x12f   :  { %399 = vsyncpa [#allocation3], 1 }

</bundles_post_ra>
